<compile_context>
chip_gen: v7x
topology: tpu7x:2x2x1
jax: 0.10.0
libtpu: 0.0.40
codegen_flags: <defaults>
</compile_context>

<pallas_src>
import functools

import jax
import jax.numpy as jnp
from jax.experimental import pallas as pl
from jax.experimental.pallas import tpu as pltpu


def _round_up(v, m):
    return (v + m - 1) // m * m


# ---------------------------------------------------------------------------
# Fast path kernel: whole (lane-padded) weight + bias resident in VMEM, single
# K block, grid over M only.  No accumulator scratch, no init/finalize phases.
# ---------------------------------------------------------------------------
def _linear_resident_kernel(x_ref, w_ref, b_ref, o_ref):
    # x_ref: (tm, K)    w_ref: (N_pad, K)  [PyTorch layout, contracted on last dim]
    # b_ref: (1, N_pad) f32                o_ref: (tm, N_pad)
    acc = jax.lax.dot_general(
        x_ref[...],
        w_ref[...],
        dimension_numbers=(((1,), (1,)), ((), ())),   # x @ W^T, no materialized transpose
        preferred_element_type=jnp.float32,
    )
    o_ref[...] = (acc + b_ref[...]).astype(o_ref.dtype)


# ---------------------------------------------------------------------------
# General path kernel: 3-D tiled matmul, K innermost, f32 VMEM accumulator.
# ---------------------------------------------------------------------------
def _linear_tiled_kernel(x_ref, w_ref, b_ref, o_ref, acc_ref):
    k = pl.program_id(2)

    @pl.when(k == 0)
    def _():
        acc_ref[...] = jnp.zeros_like(acc_ref)

    acc_ref[...] += jax.lax.dot_general(
        x_ref[...],
        w_ref[...],
        dimension_numbers=(((1,), (1,)), ((), ())),
        preferred_element_type=jnp.float32,
    )

    @pl.when(k == pl.num_programs(2) - 1)
    def _():
        o_ref[...] = (acc_ref[...] + b_ref[...]).astype(o_ref.dtype)


@functools.partial(jax.jit, static_argnames=("tm", "tn", "tk", "compute_dtype"))
def linear_pallas(x, weight, bias, *, tm=512, tn=512, tk=512,
                  compute_dtype=jnp.bfloat16):
    """y = x @ weight.T + bias, matching nn.Linear(input_dim, output_dim).

    x:      [B, input_dim]
    weight: [output_dim, input_dim]   (PyTorch convention, used as-is)
    bias:   [output_dim]
    """
    B, d_in = x.shape
    d_out, d_in_w = weight.shape
    assert d_in == d_in_w, (d_in, d_in_w)
    out_dtype = x.dtype
    out_itemsize = jnp.dtype(out_dtype).itemsize

    # bf16 MXU compute (f32 accumulate) by default; compute_dtype=None keeps exact f32.
    if compute_dtype is not None and x.dtype != compute_dtype:
        x = x.astype(compute_dtype)
        weight = weight.astype(compute_dtype)
    itemsize = jnp.dtype(x.dtype).itemsize

    bias_f32 = bias.astype(jnp.float32)
    N128 = _round_up(d_out, 128)        # lane-dense output columns (unmasked vst)

    # ---------------- fast (adapter-scale) path ----------------
    tm_f = min(512, _round_up(B, 8))
    fast_vmem = (itemsize * d_in * 2 * (tm_f + N128)          # x + resident W (double-buffered)
                 + out_itemsize * 2 * tm_f * N128             # output tiles
                 + 4 * 2 * N128)                              # bias
    if fast_vmem <= 24 * 1024 * 1024:
        # v7x has 2 TensorCores sharded over parallel grid axes: give the M axis
        # >= 2 steps when the batch is large enough to split on sublane boundaries.
        if B >= 16 and _round_up(B, tm_f) // tm_f < 2:
            tm_f = _round_up(-(-B // 2), 8)
        M_pad = _round_up(B, tm_f)

        x_p = x if M_pad == B else jnp.pad(x, ((0, M_pad - B), (0, 0)))
        w_p = weight if N128 == d_out else jnp.pad(weight, ((0, N128 - d_out), (0, 0)))
        b_p = (bias_f32 if N128 == d_out
               else jnp.pad(bias_f32, (0, N128 - d_out))).reshape(1, N128)

        cost = pl.CostEstimate(
            flops=2 * M_pad * d_in * N128,
            transcendentals=0,
            bytes_accessed=(itemsize * (M_pad * d_in + N128 * d_in)
                            + 4 * N128 + out_itemsize * M_pad * N128),
        )
        out_padded = pl.pallas_call(
            _linear_resident_kernel,
            out_shape=jax.ShapeDtypeStruct((M_pad, N128), out_dtype),
            grid_spec=pltpu.PrefetchScalarGridSpec(
                num_scalar_prefetch=0,
                grid=(M_pad // tm_f,),
                in_specs=[
                    pl.BlockSpec((tm_f, d_in), lambda i: (i, 0)),   # x rows
                    pl.BlockSpec((N128, d_in), lambda i: (0, 0)),   # weight (VMEM-resident)
                    pl.BlockSpec((1, N128), lambda i: (0, 0)),      # bias (VMEM-resident)
                ],
                out_specs=pl.BlockSpec((tm_f, N128), lambda i: (i, 0)),
            ),
            compiler_params=pltpu.CompilerParams(
                dimension_semantics=("parallel",),
                vmem_limit_bytes=32 * 1024 * 1024,
            ),
            cost_estimate=cost,
        )(x_p, w_p, b_p)
        return out_padded[:B, :d_out]

    # ---------------- general tiled path (large shapes) ----------------
    tm = min(tm, _round_up(B, 8))
    tn = min(tn, N128)
    tk = min(tk, _round_up(d_in, 128))
    M_pad = _round_up(B, tm)
    N_pad = _round_up(d_out, tn)
    K_pad = _round_up(d_in, tk)

    x_p = (x if (M_pad, K_pad) == (B, d_in)
           else jnp.pad(x, ((0, M_pad - B), (0, K_pad - d_in))))
    w_p = (weight if (N_pad, K_pad) == (d_out, d_in)
           else jnp.pad(weight, ((0, N_pad - d_out), (0, K_pad - d_in))))
    b_p = (bias_f32 if N_pad == d_out
           else jnp.pad(bias_f32, (0, N_pad - d_out))).reshape(1, N_pad)

    grid = (M_pad // tm, N_pad // tn, K_pad // tk)
    cost = pl.CostEstimate(
        flops=2 * M_pad * K_pad * N_pad,
        transcendentals=0,
        # x is re-read once per N tile, W once per M tile.
        bytes_accessed=(itemsize * (M_pad * K_pad * grid[1] + N_pad * K_pad * grid[0])
                        + 4 * N_pad + out_itemsize * M_pad * N_pad),
    )
    out_padded = pl.pallas_call(
        _linear_tiled_kernel,
        out_shape=jax.ShapeDtypeStruct((M_pad, N_pad), out_dtype),
        grid_spec=pltpu.PrefetchScalarGridSpec(
            num_scalar_prefetch=0,
            grid=grid,
            in_specs=[
                pl.BlockSpec((tm, tk), lambda i, j, k: (i, k)),   # x tile
                pl.BlockSpec((tn, tk), lambda i, j, k: (j, k)),   # weight tile (torch layout)
                pl.BlockSpec((1, tn), lambda i, j, k: (0, j)),    # bias tile (K-invariant)
            ],
            out_specs=pl.BlockSpec((tm, tn), lambda i, j, k: (i, j)),
            scratch_shapes=[pltpu.VMEM((tm, tn), jnp.float32)],
        ),
        compiler_params=pltpu.CompilerParams(
            dimension_semantics=("parallel", "parallel", "arbitrary"),
            vmem_limit_bytes=32 * 1024 * 1024,
        ),
        cost_estimate=cost,
    )(x_p, w_p, b_p)
    return out_padded[:B, :d_out]


if __name__ == "__main__":
    # Small shapes implied by the module: a batch of feature vectors through nn.Linear.
    batch, input_dim, output_dim = 8, 32, 16

    key = jax.random.PRNGKey(0)
    kx, kw, kb = jax.random.split(key, 3)

    # Deterministic parameter init mimicking nn.Linear default (U[-1/sqrt(fan_in), +...]).
    bound = 1.0 / jnp.sqrt(jnp.float32(input_dim))
    weight = jax.random.uniform(kw, (output_dim, input_dim), jnp.float32, -bound, bound)
    bias = jax.random.uniform(kb, (output_dim,), jnp.float32, -bound, bound)

    x = jax.random.normal(kx, (batch, input_dim), jnp.float32)

    y_ref = x @ weight.T + bias

    # Default path: bf16 MXU compute, f32 accumulation (loose tolerance).
    y = linear_pallas(x, weight, bias)
    jax.block_until_ready(y)
    assert y.shape == (batch, output_dim)
    assert jnp.allclose(y, y_ref, atol=5e-2, rtol=5e-2)

    # Exact f32 path for a strict reference check.
    y_f32 = linear_pallas(x, weight, bias, compute_dtype=None)
    jax.block_until_ready(y_f32)
    assert jnp.allclose(y_f32, y_ref, atol=1e-5, rtol=1e-5)

    print("KERNEL_OK")
</pallas_src>

<mosaic_0001>
module attributes {stable_mosaic.version = 11 : i64} {
  func.func @_linear_resident_kernel(%arg0: i32, %arg1: memref<8x32xbf16, #tpu.memory_space<vmem>>, %arg2: memref<128x32xbf16, #tpu.memory_space<vmem>>, %arg3: memref<1x128xf32, #tpu.memory_space<vmem>>, %arg4: memref<8x128xf32, #tpu.memory_space<vmem>>) attributes {dimension_semantics = [#tpu.dimension_semantics<parallel>], iteration_bounds = array<i64: 1>, scalar_prefetch = 0 : i64, scratch_operands = 0 : i64, tpu.core_type = #tpu.core_type<tc>, window_params = [{transform_indices = @transform_0, window_bounds = array<i64: 8, 32>}, {pipeline_mode = #tpu.pipeline_mode<synchronous>, transform_indices = @transform_1, window_bounds = array<i64: 128, 32>}, {pipeline_mode = #tpu.pipeline_mode<synchronous>, transform_indices = @transform_2, window_bounds = array<i64: 1, 128>}, {transform_indices = @transform_3, window_bounds = array<i64: 8, 128>}]} {
    %c0 = arith.constant 0 : index
    %c0_0 = arith.constant 0 : index
    %0 = vector.load %arg1[%c0, %c0_0] : memref<8x32xbf16, #tpu.memory_space<vmem>>, vector<8x32xbf16>
    %c0_1 = arith.constant 0 : index
    %c0_2 = arith.constant 0 : index
    %1 = vector.load %arg2[%c0_1, %c0_2] : memref<128x32xbf16, #tpu.memory_space<vmem>>, vector<128x32xbf16>
    %cst = arith.constant dense<0.000000e+00> : vector<8x128xf32>
    %2 = tpu.matmul %0, %1, %cst {dimension_numbers = #tpu.dot_dimension_numbers<[1], [1], [0], [0], [0, 0, 1, 0], [], []>} : vector<8x32xbf16>, vector<128x32xbf16>, vector<8x128xf32> -> vector<8x128xf32>
    %c0_3 = arith.constant 0 : index
    %c0_4 = arith.constant 0 : index
    %3 = vector.load %arg3[%c0_3, %c0_4] : memref<1x128xf32, #tpu.memory_space<vmem>>, vector<1x128xf32>
    %4 = vector.broadcast %3 : vector<1x128xf32> to vector<8x128xf32>
    %5 = arith.addf %2, %4 : vector<8x128xf32>
    %c0_5 = arith.constant 0 : index
    %c0_6 = arith.constant 0 : index
    %6 = vector.load %arg4[%c0_5, %c0_6] : memref<8x128xf32, #tpu.memory_space<vmem>>, vector<8x128xf32>
    tpu.vector_store %arg4[%c0_5, %c0_6], %5 {strides = array<i32>} : memref<8x128xf32, #tpu.memory_space<vmem>>, vector<8x128xf32>,
    return
  }
  func.func @transform_0(%arg0: i32) -> (i32, i32) {
    %c0_i32 = arith.constant 0 : i32
    %c0_i32_0 = arith.constant 0 : i32
    return %arg0, %c0_i32 : i32, i32
  }
  func.func @transform_1(%arg0: i32) -> (i32, i32) {
    %c0_i32 = arith.constant 0 : i32
    %c0_i32_0 = arith.constant 0 : i32
    %c0_i32_1 = arith.constant 0 : i32
    return %c0_i32, %c0_i32_0 : i32, i32
  }
  func.func @transform_2(%arg0: i32) -> (i32, i32) {
    %c0_i32 = arith.constant 0 : i32
    %c0_i32_0 = arith.constant 0 : i32
    %c0_i32_1 = arith.constant 0 : i32
    return %c0_i32, %c0_i32_0 : i32, i32
  }
  func.func @transform_3(%arg0: i32) -> (i32, i32) {
    %c0_i32 = arith.constant 0 : i32
    %c0_i32_0 = arith.constant 0 : i32
    return %arg0, %c0_i32 : i32, i32
  }
}

</mosaic_0001>

<bundles_post_ra>
// kernel: linear_pallas.1
= control target key start
LH: loop header
LB: loop body
LE: loop exit
PB: predicated region body
PF: predicated region fallthrough
CT: control target
= control target key end

     0   :  { %v237_v1 = vmov 0.0   ;;  %vm80_vm0 = vcmask 261120   ;;  %vm238_vm1 = vmmov 0   ;;  %s311_s0 = inlined_call_operand.vmem [shape: bf16[8,32], index: 0, kind: input, shape index: {}]   ;;  %s312_s1 = inlined_call_operand.vmem [shape: bf16[128,32], index: 1, kind: input, shape index: {}]   ;;  %s313_s2 = inlined_call_operand.vmem [shape: f32[1,128], index: 2, kind: input, shape index: {}]   ;;  %s314_s3 = inlined_call_operand.hbm [shape: f32[8,128], index: 3, kind: output, shape index: {}]  }
   0x1   :  { %v205_v0 = vld [vmem:[%s312_s1] sm:$0xff]   ;;  %182 = vmatprep.subr.bf16.mxu0 %v237_v1  ;;  %v206_v3 = vld [vmem:[%s312_s1 + $0x8] sm:$0xff]   ;;  %198 = vmatprep.mubr.msk.bf16.mxu0 %vm238_vm1, %v237_v1 }
   0x2   :  { %v85_v2 = vsel %vm80_vm0, %v205_v0, 0  ;;  %v88_v4 = vsel %vm80_vm0, %v206_v3, 0 }
   0x3   :  { %183 = vmatpush3.bf16.xpose.msra.mxu0 %v85_v2 }
   0x4   :  { %184 = vmatprep.subr.bf16.mxu0 %v237_v1 }
   0x5   :  { %8 = vsyncpa [#allocation3], 0  ;;  %v207_v5 = vld [vmem:[%s312_s1 + $0x10] sm:$0xff]   ;;  %v208_v7 = vld [vmem:[%s312_s1 + $0x18] sm:$0xff]   ;;  %s239_s5 = smov [#allocation2]  }
   0x6   :  { %v91_v6 = vsel %vm80_vm0, %v207_v5, 0  ;;  %v94_v8 = vsel %vm80_vm0, %v208_v7, 0  ;;  %v209_v9 = vld [vmem:[%s312_s1 + $0x20] sm:$0xff]   ;;  %v210_v11 = vld [vmem:[%s312_s1 + $0x28] sm:$0xff]   ;;  %v211_v13 = vld [vmem:[%s312_s1 + $0x30] sm:$0xff]   ;;  %s155_s6 = sshll.u32 %s239_s5, 4  ;;  %s156_s6 = int_to_ptr.vmem [resolvable:$true] %s155_s6 }
   0x7   :  { %v97_v10 = vsel %vm80_vm0, %v209_v9, 0  ;;  %v100_v12 = vsel %vm80_vm0, %v210_v11, 0  ;;  %v103_v14 = vsel %vm80_vm0, %v211_v13, 0  ;;  %v212_v15 = vld [vmem:[%s312_s1 + $0x38] sm:$0xff]   ;;  %v16_v17 = vld [vmem:[%s311_s0] sm:$0xf]  ;;  %p218_p1 = scmp.lt.s32.totalorder %s156_s6, %s156_s6 }
   0x8   :  { %v106_v16 = vsel %vm80_vm0, %v212_v15, 0  ;;  %v163_v18 = vld [vmem:[%s313_s2] ss:$0 sm:$0xff]  ;;  %s213_s1 = scalar_lea.vmem %s156_s6, 128 }
   0x9   :  { %p214_p0 = scmp.ne.s32.totalorder %s156_s6, %s213_s1  ;;  %p219_p2 = scmp.lt.s32.totalorder %s213_s1, %s213_s1 }
   0xb   :  { %185 = vmatpush3.bf16.xpose.msra.mxu0 %v88_v4  ;;  %p220_p3 = por %p219_p2, %p218_p1 }
   0xc   :  { %186 = vmatprep.subr.bf16.mxu0 %v237_v1 }
   0xd   :  { %p221_p4 = pnand %p220_p3, %p214_p0 }
  0x13   :  { %187 = vmatpush3.bf16.xpose.msra.mxu0 %v91_v6 }
  0x14   :  { %188 = vmatprep.subr.bf16.mxu0 %v237_v1 }
  0x1b   :  { %189 = vmatpush3.bf16.xpose.msra.mxu0 %v94_v8 }
  0x1c   :  { %190 = vmatprep.subr.bf16.mxu0 %v237_v1 }
  0x23   :  { %191 = vmatpush3.bf16.xpose.msra.mxu0 %v97_v10 }
  0x24   :  { %192 = vmatprep.subr.bf16.mxu0 %v237_v1 }
  0x2b   :  { %193 = vmatpush3.bf16.xpose.msra.mxu0 %v100_v12 }
  0x2c   :  { %194 = vmatprep.subr.bf16.mxu0 %v237_v1 }
  0x33   :  { %195 = vmatpush3.bf16.xpose.msra.mxu0 %v103_v14 }
  0x34   :  { %196 = vmatprep.subr.bf16.mxu0 %v237_v1 }
  0x3b   :  { %197 = vmatpush3.bf16.xpose.msra.mxu0 %v106_v16 }
  0x42   :  { %199 = vmatmul.mubr.msk.bf16.vlgmr.msra.gmra.mrb[0].mxu0 %vm80_vm0, %v16_v17 }
 0x115   :  { %v142_v19 = vpop.f32.mrb[0].mxu0 }
 0x116   :  { %v143_v20 = vadd.f32 %v163_v18, %v142_v19  ;;  %v200_v21 = vpop.f32.mrb[1].mxu0 }
 0x117   :  { %v145_v22 = vpop.f32.mrb[2].mxu0 }
 0x118   :  { %148 = vst [vmem:[#allocation2] sm:$0xff] %v143_v20  ;;  %v201_v23 = vpop.f32.mrb[3].mxu0 }
 0x119   :  { %224 = shalt.err (!%p221_p4)
}
 0x11a   :  { %s225_s2 = scalar_lea.hbm %s314_s3, 128 }
 0x11b   :  { %p226_p5 = scmp.ne.s32.totalorder %s314_s3, %s225_s2  ;;  %p229_p6 = scmp.lt.u32.totalorder %s225_s2, %s314_s3 }
 0x11d   :  { %p231_p7 = pnand %p229_p6, %p226_p5 }
 0x11f   :  { %234 = shalt.err (!%p231_p7)
}
 0x120   :  { %158 = dma.vmem_to_hbm [thread:$0]  %s156_s6, 128, %s314_s3, [#allocation3]  }
 0x121   :  { %235 = dma.done.wait [#allocation3], 128  }
 0x122   :  { %236 = vsyncadd [#allocation3], 4294967168 }
 0x123   :  { %162 = vsyncpa [#allocation3], 1 }

</bundles_post_ra>
